<compile_context>
chip_gen: v7x
topology: tpu7x:2x2x1
jax: 0.10.0
libtpu: 0.0.40
codegen_flags: <defaults>
</compile_context>

<pallas_src>
import jax
import jax.numpy as jnp
from jax.experimental import pallas as pl
from jax.experimental.pallas import tpu as pltpu


def _make_kernel(cin, use_vpu_first_layer):
    def kernel(x_ref, w1_ref, b1_ref, w2_ref, b2_ref, w3_ref, b3_ref, out_ref):
        if use_vpu_first_layer:
            # Tiny-K first layer: Cin broadcast+FMA VPU ops into an f32 accumulator.
            x = x_ref[...].astype(jnp.float32)              # (tile_n, cin)
            w1 = w1_ref[...].astype(jnp.float32)            # (cin, 128)
            h = x[:, 0:1] * w1[0:1, :]
            for c in range(1, cin):                         # cin < 16, fully unrolled
                h = h + x[:, c:c + 1] * w1[c:c + 1, :]
            h = h + b1_ref[...]
        else:
            # MXU path: bf16 inputs, f32 accumulation.
            x = x_ref[...].astype(jnp.bfloat16)
            h = jnp.dot(x, w1_ref[...],
                        preferred_element_type=jnp.float32) + b1_ref[...]
        h = jnp.maximum(h, 0.0)                             # ReLU (dropout == identity)

        h = jnp.dot(h.astype(jnp.bfloat16), w2_ref[...],
                    preferred_element_type=jnp.float32) + b2_ref[...]
        h = jnp.maximum(h, 0.0)

        h = jnp.dot(h.astype(jnp.bfloat16), w3_ref[...],
                    preferred_element_type=jnp.float32) + b3_ref[...]
        out_ref[...] = h.astype(out_ref.dtype)

    return kernel


def fc_block_forward(x_ncl, params, *, tile_n_max=1024, x_buffers=None):
    """x_ncl: (N, Cin, 1), PyTorch Conv1d NCL layout. Returns (N, 16) float32."""
    n, cin, length = x_ncl.shape
    assert length == 1, "FcBlock's fc1(512,128) after flatten implies length L == 1"
    x = x_ncl.reshape(n, cin)   # free squeeze; keep producer dtype (f32 or bf16)

    # ---- Exact fold: prep1 (Conv1d k=1, no bias) -> eval BN -> fc1 are all linear ----
    eps = 1e-5
    scale = params["gamma"] * jax.lax.rsqrt(params["var"] + eps)               # (1, 512)
    b_bn = params["beta"] - params["mean"] * scale                             # (1, 512)
    w_fold = ((params["w_prep"] * scale) @ params["w1"]).astype(jnp.bfloat16)  # (Cin, 128)
    b_fold = (b_bn @ params["w1"] + params["b1"]).astype(jnp.float32)          # (1, 128)
    w2 = params["w2"].astype(jnp.bfloat16)
    w3 = params["w3"].astype(jnp.bfloat16)
    b2 = params["b2"].astype(jnp.float32)
    b3 = params["b3"].astype(jnp.float32)
    d1, d2, d3 = w_fold.shape[1], w2.shape[1], w3.shape[1]

    # ---- Batch tiling: tile_n rows per grid step (multiple of 8); no jnp.pad --------
    def round_up(a, m):
        return pl.cdiv(a, m) * m

    n8 = round_up(n, 8)
    tile_n = min(tile_n_max, n8)
    if n8 >= 16:
        # Guarantee >= 2 grid steps so the "parallel" batch axis shards across both
        # TensorCores on v7x (one step would leave a TC idle).
        tile_n = min(tile_n, round_up(pl.cdiv(n8, 2), 8))
    num_tiles = pl.cdiv(n, tile_n)

    x_spec_kwargs = {}
    if x_buffers is not None:   # e.g. x_buffers=3 on v6e if the profile shows exposed DMA
        x_spec_kwargs["pipeline_mode"] = pl.Buffered(x_buffers)
    x_spec = pl.BlockSpec((tile_n, cin), lambda i: (i, 0), **x_spec_kwargs)

    def const_spec(arr):
        # Whole array, same block every step -> fetched once, stays VMEM-resident.
        return pl.BlockSpec(arr.shape, lambda i: (0, 0))

    flops = 2 * n * (cin * d1 + d1 * d2 + d2 * d3)
    bytes_accessed = (
        n * cin * x.dtype.itemsize + n * d3 * 4
        + 2 * (w_fold.size + w2.size + w3.size)
        + 4 * (b_fold.size + b2.size + b3.size))
    cost = pl.CostEstimate(flops=flops, transcendentals=0,
                           bytes_accessed=bytes_accessed)

    kernel = _make_kernel(cin, use_vpu_first_layer=(cin < 16))

    out = pl.pallas_call(
        kernel,
        out_shape=jax.ShapeDtypeStruct((n, d3), jnp.float32),
        grid=(num_tiles,),
        in_specs=[
            x_spec,
            const_spec(w_fold), const_spec(b_fold),
            const_spec(w2), const_spec(b2),
            const_spec(w3), const_spec(b3),
        ],
        out_specs=pl.BlockSpec((tile_n, d3), lambda i: (i, 0)),
        compiler_params=pltpu.CompilerParams(
            dimension_semantics=("parallel",),   # batch tiles shard across TCs (v7x)
        ),
        cost_estimate=cost,
    )(x, w_fold, b_fold, w2, b2, w3, b3)

    return out


def init_params(key, in_channel):
    prep_channel, d1, d2, d3 = 512, 128, 64, 16
    ks = jax.random.split(key, 8)
    scale = 0.05
    params = {
        # Conv1d weight in PyTorch is (512, Cin, 1); stored here transposed as (Cin, 512).
        "w_prep": scale * jax.random.normal(ks[0], (in_channel, prep_channel), jnp.float32),
        "gamma": 1.0 + scale * jax.random.normal(ks[1], (1, prep_channel), jnp.float32),
        "beta":  scale * jax.random.normal(ks[2], (1, prep_channel), jnp.float32),
        "mean":  scale * jax.random.normal(ks[3], (1, prep_channel), jnp.float32),
        "var":   1.0 + 0.1 * jax.nn.softplus(jax.random.normal(ks[4], (1, prep_channel), jnp.float32)),
        # Linear weights (PyTorch: (out, in)); stored transposed as (in, out).
        "w1": scale * jax.random.normal(ks[5], (prep_channel, d1), jnp.float32),
        "b1": scale * jnp.arange(d1, dtype=jnp.float32).reshape(1, d1) / d1,
        "w2": scale * jax.random.normal(ks[6], (d1, d2), jnp.float32),
        "b2": scale * jnp.arange(d2, dtype=jnp.float32).reshape(1, d2) / d2,
        "w3": scale * jax.random.normal(ks[7], (d2, d3), jnp.float32),
        "b3": scale * jnp.arange(d3, dtype=jnp.float32).reshape(1, d3) / d3,
    }
    return params


def reference_forward(x_ncl, p):
    """Pure-JAX f32 reference with the module's eval-mode semantics (BN running stats, no dropout)."""
    n = x_ncl.shape[0]
    x = x_ncl.reshape(n, -1)
    y = x @ p["w_prep"]
    y = (y - p["mean"]) / jnp.sqrt(p["var"] + 1e-5) * p["gamma"] + p["beta"]
    y = jnp.maximum(y @ p["w1"] + p["b1"], 0.0)
    y = jnp.maximum(y @ p["w2"] + p["b2"], 0.0)
    y = y @ p["w3"] + p["b3"]
    return y


if __name__ == "__main__":
    key = jax.random.PRNGKey(0)
    k_x, k_p = jax.random.split(key)

    batch, in_channel, seq_len = 2, 4, 1   # L must be 1 (see layout note above)
    x = jax.random.normal(k_x, (batch, in_channel, seq_len), jnp.float32)
    params = init_params(k_p, in_channel)

    out = fc_block_forward(x, params)
    out = jax.block_until_ready(out)
    assert out.shape == (batch, 16), out.shape

    # bf16 weights / bf16 inter-layer activations with f32 accumulation -> compare to the
    # f32 reference with a tolerance covering the bf16 quantization.
    ref = reference_forward(x, params)
    assert jnp.allclose(out, ref, atol=2e-2, rtol=2e-2), "mismatch vs JAX reference"

    print("KERNEL_OK")
</pallas_src>

<mosaic_0001>
module attributes {stable_mosaic.version = 11 : i64} {
  func.func @kernel(%arg0: i32, %arg1: memref<8x4xf32, #tpu.memory_space<vmem>>, %arg2: memref<4x128xbf16, #tpu.memory_space<vmem>>, %arg3: memref<1x128xf32, #tpu.memory_space<vmem>>, %arg4: memref<128x64xbf16, #tpu.memory_space<vmem>>, %arg5: memref<1x64xf32, #tpu.memory_space<vmem>>, %arg6: memref<64x16xbf16, #tpu.memory_space<vmem>>, %arg7: memref<1x16xf32, #tpu.memory_space<vmem>>, %arg8: memref<8x16xf32, #tpu.memory_space<vmem>>) attributes {dimension_semantics = [#tpu.dimension_semantics<parallel>], iteration_bounds = array<i64: 1>, scalar_prefetch = 0 : i64, scratch_operands = 0 : i64, tpu.core_type = #tpu.core_type<tc>, window_params = [{transform_indices = @transform_0, window_bounds = array<i64: 8, 4>}, {pipeline_mode = #tpu.pipeline_mode<synchronous>, transform_indices = @transform_1, window_bounds = array<i64: 4, 128>}, {pipeline_mode = #tpu.pipeline_mode<synchronous>, transform_indices = @transform_2, window_bounds = array<i64: 1, 128>}, {pipeline_mode = #tpu.pipeline_mode<synchronous>, transform_indices = @transform_3, window_bounds = array<i64: 128, 64>}, {pipeline_mode = #tpu.pipeline_mode<synchronous>, transform_indices = @transform_4, window_bounds = array<i64: 1, 64>}, {pipeline_mode = #tpu.pipeline_mode<synchronous>, transform_indices = @transform_5, window_bounds = array<i64: 64, 16>}, {pipeline_mode = #tpu.pipeline_mode<synchronous>, transform_indices = @transform_6, window_bounds = array<i64: 1, 16>}, {transform_indices = @transform_7, window_bounds = array<i64: 8, 16>}]} {
    %c0 = arith.constant 0 : index
    %c0_0 = arith.constant 0 : index
    %0 = vector.load %arg1[%c0, %c0_0] : memref<8x4xf32, #tpu.memory_space<vmem>>, vector<8x4xf32>
    %c0_1 = arith.constant 0 : index
    %c0_2 = arith.constant 0 : index
    %1 = vector.load %arg2[%c0_1, %c0_2] : memref<4x128xbf16, #tpu.memory_space<vmem>>, vector<4x128xbf16>
    %2 = arith.extf %1 : vector<4x128xbf16> to vector<4x128xf32>
    %3 = vector.extract_strided_slice %0 {offsets = [0, 0], sizes = [8, 1], strides = [1, 1]} : vector<8x4xf32> to vector<8x1xf32>
    %4 = vector.extract_strided_slice %2 {offsets = [0, 0], sizes = [1, 128], strides = [1, 1]} : vector<4x128xf32> to vector<1x128xf32>
    %5 = vector.broadcast %3 : vector<8x1xf32> to vector<8x128xf32>
    %6 = vector.broadcast %4 : vector<1x128xf32> to vector<8x128xf32>
    %7 = arith.mulf %5, %6 : vector<8x128xf32>
    %8 = vector.extract_strided_slice %0 {offsets = [0, 1], sizes = [8, 1], strides = [1, 1]} : vector<8x4xf32> to vector<8x1xf32>
    %9 = vector.extract_strided_slice %2 {offsets = [1, 0], sizes = [1, 128], strides = [1, 1]} : vector<4x128xf32> to vector<1x128xf32>
    %10 = vector.broadcast %8 : vector<8x1xf32> to vector<8x128xf32>
    %11 = vector.broadcast %9 : vector<1x128xf32> to vector<8x128xf32>
    %12 = arith.mulf %10, %11 : vector<8x128xf32>
    %13 = arith.addf %7, %12 : vector<8x128xf32>
    %14 = vector.extract_strided_slice %0 {offsets = [0, 2], sizes = [8, 1], strides = [1, 1]} : vector<8x4xf32> to vector<8x1xf32>
    %15 = vector.extract_strided_slice %2 {offsets = [2, 0], sizes = [1, 128], strides = [1, 1]} : vector<4x128xf32> to vector<1x128xf32>
    %16 = vector.broadcast %14 : vector<8x1xf32> to vector<8x128xf32>
    %17 = vector.broadcast %15 : vector<1x128xf32> to vector<8x128xf32>
    %18 = arith.mulf %16, %17 : vector<8x128xf32>
    %19 = arith.addf %13, %18 : vector<8x128xf32>
    %20 = vector.extract_strided_slice %0 {offsets = [0, 3], sizes = [8, 1], strides = [1, 1]} : vector<8x4xf32> to vector<8x1xf32>
    %21 = vector.extract_strided_slice %2 {offsets = [3, 0], sizes = [1, 128], strides = [1, 1]} : vector<4x128xf32> to vector<1x128xf32>
    %22 = vector.broadcast %20 : vector<8x1xf32> to vector<8x128xf32>
    %23 = vector.broadcast %21 : vector<1x128xf32> to vector<8x128xf32>
    %24 = arith.mulf %22, %23 : vector<8x128xf32>
    %25 = arith.addf %19, %24 : vector<8x128xf32>
    %c0_3 = arith.constant 0 : index
    %c0_4 = arith.constant 0 : index
    %26 = vector.load %arg3[%c0_3, %c0_4] : memref<1x128xf32, #tpu.memory_space<vmem>>, vector<1x128xf32>
    %27 = vector.broadcast %26 : vector<1x128xf32> to vector<8x128xf32>
    %28 = arith.addf %25, %27 : vector<8x128xf32>
    %cst = arith.constant 0.000000e+00 : f32
    %29 = vector.broadcast %cst : f32 to vector<8x128xf32>
    %30 = arith.maximumf %28, %29 : vector<8x128xf32>
    %31 = arith.truncf %30 : vector<8x128xf32> to vector<8x128xbf16>
    %c0_5 = arith.constant 0 : index
    %c0_6 = arith.constant 0 : index
    %32 = vector.load %arg4[%c0_5, %c0_6] : memref<128x64xbf16, #tpu.memory_space<vmem>>, vector<128x64xbf16>
    %cst_7 = arith.constant dense<0.000000e+00> : vector<8x64xf32>
    %33 = tpu.matmul %31, %32, %cst_7 {dimension_numbers = #tpu.dot_dimension_numbers<[1], [0], [0], [1], [0, 0, 1, 1], [], []>} : vector<8x128xbf16>, vector<128x64xbf16>, vector<8x64xf32> -> vector<8x64xf32>
    %c0_8 = arith.constant 0 : index
    %c0_9 = arith.constant 0 : index
    %34 = vector.load %arg5[%c0_8, %c0_9] : memref<1x64xf32, #tpu.memory_space<vmem>>, vector<1x64xf32>
    %35 = vector.broadcast %34 : vector<1x64xf32> to vector<8x64xf32>
    %36 = arith.addf %33, %35 : vector<8x64xf32>
    %cst_10 = arith.constant 0.000000e+00 : f32
    %37 = vector.broadcast %cst_10 : f32 to vector<8x64xf32>
    %38 = arith.maximumf %36, %37 : vector<8x64xf32>
    %39 = arith.truncf %38 : vector<8x64xf32> to vector<8x64xbf16>
    %c0_11 = arith.constant 0 : index
    %c0_12 = arith.constant 0 : index
    %40 = vector.load %arg6[%c0_11, %c0_12] : memref<64x16xbf16, #tpu.memory_space<vmem>>, vector<64x16xbf16>
    %cst_13 = arith.constant dense<0.000000e+00> : vector<8x16xf32>
    %41 = tpu.matmul %39, %40, %cst_13 {dimension_numbers = #tpu.dot_dimension_numbers<[1], [0], [0], [1], [0, 0, 1, 1], [], []>} : vector<8x64xbf16>, vector<64x16xbf16>, vector<8x16xf32> -> vector<8x16xf32>
    %c0_14 = arith.constant 0 : index
    %c0_15 = arith.constant 0 : index
    %42 = vector.load %arg7[%c0_14, %c0_15] : memref<1x16xf32, #tpu.memory_space<vmem>>, vector<1x16xf32>
    %43 = vector.broadcast %42 : vector<1x16xf32> to vector<8x16xf32>
    %44 = arith.addf %41, %43 : vector<8x16xf32>
    %c0_16 = arith.constant 0 : index
    %c0_17 = arith.constant 0 : index
    %45 = vector.load %arg8[%c0_16, %c0_17] : memref<8x16xf32, #tpu.memory_space<vmem>>, vector<8x16xf32>
    tpu.vector_store %arg8[%c0_16, %c0_17], %44 {strides = array<i32>} : memref<8x16xf32, #tpu.memory_space<vmem>>, vector<8x16xf32>,
    return
  }
  func.func @transform_0(%arg0: i32) -> (i32, i32) {
    %c0_i32 = arith.constant 0 : i32
    %c0_i32_0 = arith.constant 0 : i32
    return %arg0, %c0_i32 : i32, i32
  }
  func.func @transform_1(%arg0: i32) -> (i32, i32) {
    %c0_i32 = arith.constant 0 : i32
    %c0_i32_0 = arith.constant 0 : i32
    %c0_i32_1 = arith.constant 0 : i32
    return %c0_i32, %c0_i32_0 : i32, i32
  }
  func.func @transform_2(%arg0: i32) -> (i32, i32) {
    %c0_i32 = arith.constant 0 : i32
    %c0_i32_0 = arith.constant 0 : i32
    %c0_i32_1 = arith.constant 0 : i32
    return %c0_i32, %c0_i32_0 : i32, i32
  }
  func.func @transform_3(%arg0: i32) -> (i32, i32) {
    %c0_i32 = arith.constant 0 : i32
    %c0_i32_0 = arith.constant 0 : i32
    %c0_i32_1 = arith.constant 0 : i32
    return %c0_i32, %c0_i32_0 : i32, i32
  }
  func.func @transform_4(%arg0: i32) -> (i32, i32) {
    %c0_i32 = arith.constant 0 : i32
    %c0_i32_0 = arith.constant 0 : i32
    %c0_i32_1 = arith.constant 0 : i32
    return %c0_i32, %c0_i32_0 : i32, i32
  }
  func.func @transform_5(%arg0: i32) -> (i32, i32) {
    %c0_i32 = arith.constant 0 : i32
    %c0_i32_0 = arith.constant 0 : i32
    %c0_i32_1 = arith.constant 0 : i32
    return %c0_i32, %c0_i32_0 : i32, i32
  }
  func.func @transform_6(%arg0: i32) -> (i32, i32) {
    %c0_i32 = arith.constant 0 : i32
    %c0_i32_0 = arith.constant 0 : i32
    %c0_i32_1 = arith.constant 0 : i32
    return %c0_i32, %c0_i32_0 : i32, i32
  }
  func.func @transform_7(%arg0: i32) -> (i32, i32) {
    %c0_i32 = arith.constant 0 : i32
    %c0_i32_0 = arith.constant 0 : i32
    return %arg0, %c0_i32 : i32, i32
  }
}

</mosaic_0001>

<bundles_post_ra>
// kernel: tpu_custom_call.1
= control target key start
LH: loop header
LB: loop body
LE: loop exit
PB: predicated region body
PF: predicated region fallthrough
CT: control target
= control target key end

     0   :  { %v407_v2 = vmov 0   ;;  %v408_v3 = vmov 2   ;;  %s533_s0 = inlined_call_operand.vmem [shape: f32[2,4], index: 0, kind: input, shape index: {}]   ;;  %s534_s1 = inlined_call_operand.vmem [shape: bf16[4,128], index: 1, kind: input, shape index: {}]   ;;  %s535_s2 = inlined_call_operand.vmem [shape: f32[1,128], index: 2, kind: input, shape index: {}]   ;;  %s536_s3 = inlined_call_operand.vmem [shape: bf16[128,64], index: 3, kind: input, shape index: {}]   ;;  %s537_s4 = inlined_call_operand.vmem [shape: f32[1,64], index: 4, kind: input, shape index: {}]   ;;  %s538_s5 = inlined_call_operand.vmem [shape: bf16[64,16], index: 5, kind: input, shape index: {}]   ;;  %s539_s6 = inlined_call_operand.vmem [shape: f32[1,16], index: 6, kind: input, shape index: {}]   ;;  %s540_s7 = inlined_call_operand.hbm [shape: f32[2,16], index: 7, kind: output, shape index: {}]  }
   0x1   :  { %v28_v0 = vld [vmem:[%s533_s0] sm:$0xff]  ;;  %366 = vset.pattern.permute.xlu0 %v407_v2  ;;  %368 = vset.pattern.permute.xlu1 %v408_v3 }
   0x2   :  { %v371_v1 = vld [vmem:[%s536_s3] sm:$0xff]  }
   0x3   :  { %12 = vsyncpa [#allocation3], 0  ;;  %33 = vperm.xlu0 %366, %v28_v0   ;;  %52 = vperm.xlu1 %368, %v28_v0   ;;  %v409_v4 = vmov 0.0   ;;  %v372_v5 = vld [vmem:[%s536_s3 + $0x8] sm:$0xff]   ;;  %v410_v6 = vmov 1   ;;  %v411_v7 = vmov 3   ;;  %v36_v16 = vlaneseq }
   0x4   :  { %325 = vmatprep.subr.bf16.mxu0 %v409_v4  ;;  %345 = vmatprep.subr.bf16.mxu1 %v409_v4  ;;  %v373_v8 = vld [vmem:[%s536_s3 + $0x10] sm:$0xff]   ;;  %v374_v9 = vld [vmem:[%s536_s3 + $0x18] sm:$0xff]   ;;  %v375_v10 = vld [vmem:[%s536_s3 + $0x20] sm:$0xff]   ;;  %vm412_vm0 = vmmov 0   ;;  %vm233_vm1 = vcmask 523264   ;;  %vm277_vm2 = vcmask 130048  }
   0x5   :  { %326 = vmatpush3.bf16.msra.mxu0 %v371_v1  ;;  %341 = vmatprep.mubr.msk.bf16.mxu0 %vm412_vm0, %v409_v4  ;;  %v376_v11 = vld [vmem:[%s536_s3 + $0x28] sm:$0xff]   ;;  %v379_v12 = vld [vmem:[%s538_s5] sm:$0xff]   ;;  %v377_v14 = vld [vmem:[%s536_s3 + $0x30] sm:$0xff]   ;;  %v37_v17 = vshrl.u32 %v36_v16, 7 }
   0x6   :  { %327 = vmatprep.subr.bf16.mxu0 %v409_v4  ;;  %353 = vmatprep.mubr.msk.bf16.mxu1 %vm412_vm0, %v409_v4  ;;  %v380_v13 = vld [vmem:[%s538_s5 + $0x8] sm:$0xff]   ;;  %v378_v15 = vld [vmem:[%s536_s3 + $0x38] sm:$0xff]   ;;  %v29_v18 = vld [vmem:[%s534_s1] sm:$0x3] }
   0x7   :  { %367 = vset.pattern.permute.xlu0 %v410_v6  ;;  %369 = vset.pattern.permute.xlu1 %v411_v7  ;;  %v30_v19 = vunpack.c.l.bf16 %v29_v18  ;;  %v38_v20 = vsub.s32 0, %v37_v17  ;;  %v47_v21 = vsub.s32 1, %v37_v17  ;;  %v57_v23 = vsub.s32 2, %v37_v17  ;;  %v295_v38 = vld [vmem:[%s535_s2] ss:$0 sm:$0xff]  ;;  %v381_v43 = vld [vmem:[%s538_s5 + $0x10] sm:$0xff]  }
   0x8   :  { %42 = vperm.xlu0 %367, %v28_v0   ;;  %62 = vperm.xlu1 %369, %v28_v0   ;;  %v67_v25 = vsub.s32 3, %v37_v17  ;;  %v382_v44 = vld [vmem:[%s538_s5 + $0x18] sm:$0xff]   ;;  %v296_v45 = vld [vmem:[%s537_s4] ss:$0 sm:$0xff] }
   0x9   :  { %328 = vmatpush3.bf16.msra.mxu0 %v372_v5  ;;  %346 = vmatpush3.bf16.msra.mxu1 %v379_v12  ;;  %v39_v26 = vrot.slane %v30_v19, %v38_v20  ;;  %v48_v27 = vrot.slane %v30_v19, %v47_v21  ;;  %v58_v28 = vrot.slane %v30_v19, %v57_v23  ;;  %v305_v53 = vld [vmem:[%s539_s6] ss:$0 sm:$0xff] }
   0xa   :  { %329 = vmatprep.subr.bf16.mxu0 %v409_v4  ;;  %347 = vmatprep.subr.bf16.mxu1 %v409_v4  ;;  %v68_v29 = vrot.slane %v30_v19, %v67_v25 }
   0xc   :  { %370 = vset.pattern.permute.xlu0 %v411_v7 }
   0xd   :  { %330 = vmatpush3.bf16.msra.mxu0 %v373_v8  ;;  %348 = vmatpush3.bf16.msra.mxu1 %v380_v13 }
   0xe   :  { %331 = vmatprep.subr.bf16.mxu0 %v409_v4  ;;  %349 = vmatprep.subr.bf16.mxu1 %v409_v4 }
  0x11   :  { %332 = vmatpush3.bf16.msra.mxu0 %v374_v9  ;;  %350 = vmatpush3.bf16.msra.mxu1 %v381_v43 }
  0x12   :  { %333 = vmatprep.subr.bf16.mxu0 %v409_v4  ;;  %351 = vmatprep.subr.bf16.mxu1 %v409_v4 }
  0x15   :  { %334 = vmatpush3.bf16.msra.mxu0 %v375_v10  ;;  %352 = vmatpush3.bf16.msra.mxu1 %v382_v44 }
  0x16   :  { %335 = vmatprep.subr.bf16.mxu0 %v409_v4 }
  0x19   :  { %336 = vmatpush3.bf16.msra.mxu0 %v376_v11 }
  0x1a   :  { %337 = vmatprep.subr.bf16.mxu0 %v409_v4 }
  0x1d   :  { %338 = vmatpush3.bf16.msra.mxu0 %v377_v14 }
  0x1e   :  { %339 = vmatprep.subr.bf16.mxu0 %v409_v4 }
  0x21   :  { %340 = vmatpush3.bf16.msra.mxu0 %v378_v15 }
  0x82   :  { %v34_v22 = vpop.permute.xlu0 %33  ;;  %v53_v24 = vpop.permute.xlu1 %52 }
  0x83   :  { %v40_v32 = vmul.f32 %v39_v26, %v34_v22  ;;  %v59_v34 = vmul.f32 %v58_v28, %v53_v24 }
  0x87   :  { %v43_v30 = vpop.permute.xlu0 %42  ;;  %v63_v31 = vpop.permute.xlu1 %62 }
  0x88   :  { %v49_v33 = vmul.f32 %v48_v27, %v43_v30  ;;  %v69_v36 = vmul.f32 %v68_v29, %v63_v31 }
  0x8a   :  { %v50_v35 = vadd.f32 %v49_v33, %v40_v32 }
  0x8c   :  { %v60_v37 = vadd.f32 %v59_v34, %v50_v35 }
  0x8e   :  { %v70_v39 = vadd.f32 %v69_v36, %v60_v37 }
  0x90   :  { %v78_v40 = vadd.f32 %v295_v38, %v70_v39 }
  0x92   :  { %v79_v41 = vmax.f32 %v78_v40, 0.0 }
  0x94   :  { %v80_v42 = vpack.c.bf16 %v79_v41, %v79_v41 }
  0x96   :  { %342 = vmatmul.mubr.bf16.vlgmr.msra.gmra.mrb[0].mxu0 %v80_v42 }
 0x169   :  { %v186_v46 = vpop.f32.mrb[0].mxu0 }
 0x16a   :  { %v187_v47 = vadd.f32 %v296_v45, %v186_v46  ;;  %v343_v48 = vpop.f32.mrb[1].mxu0 }
 0x16b   :  { %v189_v49 = vpop.f32.mrb[2].mxu0 }
 0x16c   :  { %v192_v50 = vmax.f32 %v187_v47, 0.0  ;;  %v344_v51 = vpop.f32.mrb[3].mxu0 }
 0x16e   :  { %v193_v52 = vpack.c.bf16 %v192_v50, %v192_v50 }
 0x170   :  { %354 = vmatmul.mubr.msk.bf16.vlgmr.msra.gmra.mrb[0].mxu1 %vm233_vm1, %v193_v52 }
 0x243   :  { %v271_v54 = vpop.f32.mrb[0].mxu1 }
 0x244   :  { %v272_v55 = vadd.f32 %v305_v53, %v271_v54  ;;  %v355_v56 = vpop.f32.mrb[1].mxu1 }
 0x245   :  { %v274_v57 = vpop.f32.mrb[2].mxu1 }
 0x246   :  { %278 = vst.msk [vmem:[#allocation2] sm:$0xff] %vm277_vm2, %v272_v55  ;;  %v356_v58 = vpop.f32.mrb[3].mxu1 }
 0x247   :  { %283 = vsyncadd [#allocation3], 96  ;;  %s413_s4 = smov [#allocation2]  }
 0x248   :  { %s284_s5 = sshll.u32 %s413_s4, 4  ;;  %s285_s5 = int_to_ptr.vmem [resolvable:$true] %s284_s5 }
 0x249   :  { %s383_s30 = scalar_lea.vmem %s285_s5, 32  ;;  %s387_s8 = scalar_lea.vmem %s285_s5, 128 }
 0x24a   :  { %p384_p0 = scmp.ne.s32.totalorder %s285_s5, %s383_s30  ;;  %p388_p1 = scmp.lt.s32.totalorder %s285_s5, %s285_s5 }
 0x24b   :  { %p389_p2 = scmp.lt.s32.totalorder %s387_s8, %s383_s30 }
 0x24d   :  { %p390_p3 = por %p389_p2, %p388_p1 }
 0x24f   :  { %p391_p4 = pnand %p390_p3, %p384_p0 }
 0x251   :  { %394 = shalt.err (!%p391_p4)
}
 0x252   :  { %s395_s10 = scalar_lea.hbm %s540_s7, 32 }
 0x253   :  { %p396_p5 = scmp.ne.s32.totalorder %s540_s7, %s395_s10  ;;  %p399_p6 = scmp.lt.u32.totalorder %s395_s10, %s540_s7 }
 0x255   :  { %p401_p7 = pnand %p399_p6, %p396_p5 }
 0x257   :  { %404 = shalt.err (!%p401_p7)
}
 0x258   :  { %s414_s15 = smov 32   ;;  %s415_s16 = smov 2  }
 0x259   :  { %290 = dma.vmem_to_hbm [thread:$0]  %s285_s5, 32, %s540_s7, [#allocation3], %s414_s15, %s414_s15, %s415_s16  }
 0x25a   :  { %405 = dma.done.wait [#allocation3], 128  }
 0x25b   :  { %406 = vsyncadd [#allocation3], 4294967168 }
 0x25c   :  { %294 = vsyncpa [#allocation3], 1 }

</bundles_post_ra>
